<compile_context>
chip_gen: v6e
topology: v6e:2x2x1
jax: 0.10.0
libtpu: 0.0.40
codegen_flags: <defaults>
</compile_context>

<pallas_src>
import functools

import jax
import jax.numpy as jnp
from jax.experimental import pallas as pl
from jax.experimental.pallas import tpu as pltpu


def _round_up(n, m):
    return ((n + m - 1) // m) * m


def _pick_tile_d(dp, tile_d):
    """Largest multiple of 128 <= min(tile_d, dp) that evenly divides dp."""
    cap = max(128, min(_round_up(tile_d, 128), dp))
    t = (cap // 128) * 128
    while dp % t:
        t -= 128
    return t


def _ae_bottleneck_loss_kernel(x_ref, weT_ref, be_ref, wd_ref, bd_ref, out_ref,
                               z_ref, sq_ref, *, t_d, inv_count, x_resident):
    """Two-phase tiled AE-bottleneck reconstruction loss.

    grid = (2, nD):
      phase p=0 : z += x_tile . WeT_tile (contract D); bias+ReLU at last tile
      phase p=1 : recon = relu_z @ Wd_tile + bd ; sq += (recon - x_tile)^2

    x_ref  : [B, Dp] (resident) or [B, tD] (streamed), f32 activation
    weT_ref: [H, tD] bf16   encoder weight, transposed (lane-dense)
    be_ref : [1, H]  f32    encoder bias
    wd_ref : [H, tD] bf16   decoder weight tile
    bd_ref : [1, tD] f32    decoder bias tile
    out_ref: [1, 1]  f32    scalar loss (written once, last grid step)
    z_ref  : [B, H]  f32    VMEM scratch (encoder output after ReLU)
    sq_ref : [B, tD] f32    VMEM scratch (elementwise squared-error accumulator)
    """
    p = pl.program_id(0)      # 0 = encoder contraction, 1 = decoder + MSE
    d = pl.program_id(1)      # D-tile index
    nd = pl.num_programs(1)

    def x_tile():
        if x_resident:
            off = pl.multiple_of(d * t_d, 128)
            return x_ref[:, pl.ds(off, t_d)]
        return x_ref[...]

    @pl.when(jnp.logical_and(p == 0, d == 0))
    def _init():
        z_ref[...] = jnp.zeros_like(z_ref)
        sq_ref[...] = jnp.zeros_like(sq_ref)

    @pl.when(p == 0)
    def _encoder():
        # x[B,tD] . WeT[H,tD] contracted on tD -> [B,H]; bf16 MXU, f32 accum.
        xt = x_tile().astype(jnp.bfloat16)
        z_ref[...] += jax.lax.dot_general(
            xt, weT_ref[...],
            dimension_numbers=(((1,), (1,)), ((), ())),
            preferred_element_type=jnp.float32)

    @pl.when(jnp.logical_and(p == 0, d == nd - 1))
    def _finalize_encoder():
        # Bias + ReLU applied exactly once, after the full D contraction.
        z_ref[...] = jnp.maximum(z_ref[...] + be_ref[...], 0.0)

    @pl.when(p == 1)
    def _decoder_partial_mse():
        recon = jnp.dot(z_ref[...].astype(jnp.bfloat16), wd_ref[...],
                        preferred_element_type=jnp.float32) + bd_ref[...]
        diff = recon - x_tile()          # f32 target: no bf16 quantization bias
        sq_ref[...] += diff * diff       # VPU-only per-tile accumulation

    @pl.when(jnp.logical_and(p == 1, d == nd - 1))
    def _write_out():
        out_ref[...] = jnp.sum(sq_ref[...], keepdims=True) * inv_count


@functools.partial(jax.jit, static_argnames=("tile_d",))
def ae_bottleneck_loss(x_flat, weT, be, wd, bd, *, tile_d=8192):
    """mean((decoder(relu(encoder(x))) - x)**2) for one bottleneck.

    x_flat: [B, D] f32, weT: [H, Dp] bf16 (encoder weight transposed),
    be: [1, H] f32, wd: [H, Dp] bf16, bd: [1, Dp] f32  (Dp = round_up(D, 128)).
    """
    B, D = x_flat.shape
    H, Dp = weT.shape

    x_flat = x_flat.astype(jnp.float32)
    if Dp != D:
        # Only the 128-lane remainder is padded; zero weight/bias columns make
        # the padding contribute exactly 0 to both z and the squared error.
        x_flat = jnp.pad(x_flat, ((0, 0), (0, Dp - D)))

    t_d = _pick_tile_d(Dp, tile_d)
    n_d = Dp // t_d

    # Keep x resident in VMEM across both phases when cheap to do so
    # (drops the second HBM pass over the activation in phase 1).
    x_resident = 2 * _round_up(B, 8) * Dp * 4 <= (16 << 20)

    if x_resident:
        x_spec = pl.BlockSpec((B, Dp), lambda p, d: (0, 0))
        x_block_cols = Dp
    else:
        x_spec = pl.BlockSpec((B, t_d), lambda p, d: (0, d))
        x_block_cols = t_d

    # We is only read in phase 0; hold its last block during phase 1 so the
    # phase transition does not trigger a redundant DMA.
    weT_spec = pl.BlockSpec((H, t_d),
                            lambda p, d: (0, d * (1 - p) + (n_d - 1) * p))
    be_spec = pl.BlockSpec((1, H), lambda p, d: (0, 0))
    wd_spec = pl.BlockSpec((H, t_d), lambda p, d: (0, d * p))
    bd_spec = pl.BlockSpec((1, t_d), lambda p, d: (0, d * p))
    out_spec = pl.BlockSpec((1, 1), lambda p, d: (0, 0))

    kernel = functools.partial(_ae_bottleneck_loss_kernel, t_d=t_d,
                               inv_count=1.0 / float(B * D),
                               x_resident=x_resident)

    # VMEM budget: double-buffered blocks + scratch, padded to (sublane, lane)
    # tiles, plus headroom for compiler-internal scratch.
    def _blk(rows, cols, itemsize, sub):
        return _round_up(rows, sub) * _round_up(cols, 128) * itemsize

    vmem_live = (2 * _blk(B, x_block_cols, 4, 8)        # x
                 + 2 * 2 * _blk(H, t_d, 2, 16)          # WeT + Wd (bf16)
                 + 2 * _blk(1, H, 4, 8)                 # be
                 + 2 * _blk(1, t_d, 4, 8)               # bd
                 + 2 * _blk(1, 1, 4, 8)                 # out
                 + _blk(B, H, 4, 8)                     # z scratch
                 + _blk(B, t_d, 4, 8))                  # squared-error scratch
    vmem_limit = int(max(vmem_live + vmem_live // 2 + (2 << 20), 4 << 20))

    bytes_accessed = (B * Dp * 4 * (1 if x_resident else 2)  # activation (f32)
                      + 2 * H * Dp * 2                       # WeT + Wd (bf16)
                      + H * 4 + Dp * 4 + 4)                  # biases + scalar

    out = pl.pallas_call(
        kernel,
        out_shape=jax.ShapeDtypeStruct((1, 1), jnp.float32),
        grid_spec=pltpu.PrefetchScalarGridSpec(
            num_scalar_prefetch=0,
            grid=(2, n_d),
            in_specs=[x_spec, weT_spec, be_spec, wd_spec, bd_spec],
            out_specs=out_spec,
            scratch_shapes=[
                pltpu.VMEM((B, H), jnp.float32),     # encoder output z
                pltpu.VMEM((B, t_d), jnp.float32),   # squared-error accumulator
            ]),
        compiler_params=pltpu.CompilerParams(
            # Both grid axes carry dependencies (phase order, D reduction).
            dimension_semantics=("arbitrary", "arbitrary"),
            vmem_limit_bytes=vmem_limit),
        cost_estimate=pl.CostEstimate(
            flops=4 * B * Dp * H,
            transcendentals=0,
            bytes_accessed=int(bytes_accessed)),
    )(x_flat, weT, be, wd, bd)
    return out[0, 0]


class AEBottleneckRegPallas:
    """JAX/Pallas re-implementation of AEBottleneckReg.

    PyTorch registers forward hooks that collect per-layer AE-bottleneck losses
    during the model's forward pass; here the captured intermediate layer
    outputs are passed explicitly.  AE parameters are converted ONCE at
    construction into the kernel layout (transposed, bf16, 128-lane padded) so
    no per-step weight cast/pad ever runs.
    """

    def __init__(self, bottleneck_params, burn_in, tile_d=8192):
        # bottleneck_params: list of dicts {we, be, wd, bd}, one per hooked layer.
        self.burn_in = burn_in
        self.tile_d = tile_d
        self.prepared = [self._prepare(p) for p in bottleneck_params]
        self.losses = []

    @staticmethod
    def _prepare(params):
        we = jnp.asarray(params["we"])                       # (D, H)
        wd = jnp.asarray(params["wd"])                       # (H, D)
        be = jnp.asarray(params["be"]).reshape(1, -1).astype(jnp.float32)
        bd = jnp.asarray(params["bd"]).reshape(1, -1).astype(jnp.float32)
        D = we.shape[0]
        Dp = _round_up(D, 128)
        weT = we.T.astype(jnp.bfloat16)                      # lane-dense (H, D)
        wdb = wd.astype(jnp.bfloat16)
        if Dp != D:
            pad = ((0, 0), (0, Dp - D))
            weT = jnp.pad(weT, pad)
            wdb = jnp.pad(wdb, pad)
            bd = jnp.pad(bd, pad)
        return {"weT": weT, "be": be, "wd": wdb, "bd": bd}

    def __call__(self, model, batch, outs, step, epoch, hooked_layer_outputs):
        self.losses = []
        if epoch < self.burn_in:
            return jnp.float32(0.0)
        # TODO(synk): fuse this loop into one pallas_call with a leading
        #             "parallel" bottleneck axis (dual-TC on v7x).
        for layer_out, prm in zip(hooked_layer_outputs, self.prepared):
            bs = layer_out.shape[0]
            x_flat = layer_out.reshape(bs, -1)
            self.losses.append(
                ae_bottleneck_loss(x_flat, prm["weT"], prm["be"], prm["wd"],
                                   prm["bd"], tile_d=self.tile_d))
        return sum(self.losses)


def _make_bottleneck_params(key, d, hidden):
    k0, k1, k2, k3 = jax.random.split(key, 4)
    scale_e = 1.0 / jnp.sqrt(jnp.float32(d))
    scale_d = 1.0 / jnp.sqrt(jnp.float32(hidden))
    return {
        "we": jax.random.normal(k0, (d, hidden), jnp.float32) * scale_e,
        "be": jax.random.normal(k1, (1, hidden), jnp.float32) * 0.01,
        "wd": jax.random.normal(k2, (hidden, d), jnp.float32) * scale_d,
        "bd": jax.random.normal(k3, (1, d), jnp.float32) * 0.01,
    }


if __name__ == "__main__":
    key = jax.random.PRNGKey(0)
    k_act1, k_act2, k_bn1, k_bn2 = jax.random.split(key, 4)

    # Simulated hooked intermediate layer outputs (NCHW, as PyTorch conv emits).
    B = 2
    act1 = jax.random.normal(k_act1, (B, 4, 16, 16), jnp.float32)   # D = 1024
    act2 = jax.random.normal(k_act2, (B, 8, 8, 8), jnp.float32)     # D = 512
    hooked_layer_outputs = [act1, act2]

    hidden = 32
    bottleneck_params = [
        _make_bottleneck_params(k_bn1, 4 * 16 * 16, hidden),
        _make_bottleneck_params(k_bn2, 8 * 8 * 8, hidden),
    ]

    reg = AEBottleneckRegPallas(bottleneck_params, burn_in=1)

    # epoch < burn_in -> 0 (matches the PyTorch early-return branch).
    loss_early = reg(model=None, batch=None, outs=None, step=0, epoch=0,
                     hooked_layer_outputs=hooked_layer_outputs)
    loss_early = jax.block_until_ready(jnp.asarray(loss_early))
    assert float(loss_early) == 0.0

    # epoch >= burn_in -> sum of per-bottleneck AE reconstruction losses.
    loss = reg(model=None, batch=None, outs=None, step=10, epoch=2,
               hooked_layer_outputs=hooked_layer_outputs)
    loss = jax.block_until_ready(loss)

    # Pure-JAX f32 reference (kernel streams bf16 weights, so tolerance is
    # loosened accordingly — acceptable for a regularizer).
    def ref_loss(x, p):
        xf = x.reshape(x.shape[0], -1).astype(jnp.float32)
        z = jnp.maximum(xf @ p["we"] + p["be"], 0.0)
        r = z @ p["wd"] + p["bd"]
        return jnp.mean((r - xf) ** 2)

    expected = sum(ref_loss(a, p) for a, p in zip(hooked_layer_outputs,
                                                  bottleneck_params))
    assert jnp.allclose(loss, expected, rtol=2e-2, atol=2e-3), (loss, expected)

    print("KERNEL_OK")
</pallas_src>

<mosaic_0001>
module attributes {stable_mosaic.version = 11 : i64} {
  func.func @_ae_bottleneck_loss_kernel(%arg0: i32, %arg1: i32, %arg2: memref<2x1024xf32, #tpu.memory_space<vmem>>, %arg3: memref<32x1024xbf16, #tpu.memory_space<vmem>>, %arg4: memref<1x32xf32, #tpu.memory_space<vmem>>, %arg5: memref<32x1024xbf16, #tpu.memory_space<vmem>>, %arg6: memref<1x1024xf32, #tpu.memory_space<vmem>>, %arg7: memref<1x1xf32, #tpu.memory_space<vmem>>, %arg8: memref<2x32xf32, #tpu.memory_space<vmem>>, %arg9: memref<2x1024xf32, #tpu.memory_space<vmem>>) attributes {dimension_semantics = [#tpu.dimension_semantics<arbitrary>, #tpu.dimension_semantics<arbitrary>], iteration_bounds = array<i64: 2, 1>, scalar_prefetch = 0 : i64, scratch_operands = 2 : i64, tpu.core_type = #tpu.core_type<tc>, window_params = [{pipeline_mode = #tpu.pipeline_mode<synchronous>, transform_indices = @transform_0, window_bounds = array<i64: 2, 1024>}, {transform_indices = @transform_1, window_bounds = array<i64: 32, 1024>}, {pipeline_mode = #tpu.pipeline_mode<synchronous>, transform_indices = @transform_2, window_bounds = array<i64: 1, 32>}, {transform_indices = @transform_3, window_bounds = array<i64: 32, 1024>}, {transform_indices = @transform_4, window_bounds = array<i64: 1, 1024>}, {pipeline_mode = #tpu.pipeline_mode<synchronous>, transform_indices = @transform_5, window_bounds = array<i64: 1, 1>}]} {
    %c0_i32 = arith.constant 0 : i32
    %0 = arith.cmpi eq, %arg0, %c0_i32 : i32
    %c0_i32_0 = arith.constant 0 : i32
    %1 = arith.cmpi eq, %arg1, %c0_i32_0 : i32
    %2 = arith.andi %0, %1 : i1
    %3 = arith.extui %2 : i1 to i32
    %c0_i32_1 = arith.constant 0 : i32
    %4 = arith.cmpi ne, %3, %c0_i32_1 : i32
    scf.if %4 {
      %cst = arith.constant 0.000000e+00 : f32
      %21 = vector.broadcast %cst : f32 to vector<2x32xf32>
      %c0 = arith.constant 0 : index
      %c0_11 = arith.constant 0 : index
      %22 = vector.load %arg8[%c0, %c0_11] : memref<2x32xf32, #tpu.memory_space<vmem>>, vector<2x32xf32>
      tpu.vector_store %arg8[%c0, %c0_11], %21 {strides = array<i32>} : memref<2x32xf32, #tpu.memory_space<vmem>>, vector<2x32xf32>,
      %cst_12 = arith.constant 0.000000e+00 : f32
      %23 = vector.broadcast %cst_12 : f32 to vector<2x1024xf32>
      %c0_13 = arith.constant 0 : index
      %c0_14 = arith.constant 0 : index
      %24 = vector.load %arg9[%c0_13, %c0_14] : memref<2x1024xf32, #tpu.memory_space<vmem>>, vector<2x1024xf32>
      tpu.vector_store %arg9[%c0_13, %c0_14], %23 {strides = array<i32>} : memref<2x1024xf32, #tpu.memory_space<vmem>>, vector<2x1024xf32>,
    } else {
    }
    %c0_i32_2 = arith.constant 0 : i32
    %5 = arith.cmpi eq, %arg0, %c0_i32_2 : i32
    %6 = arith.extui %5 : i1 to i32
    %c0_i32_3 = arith.constant 0 : i32
    %7 = arith.cmpi ne, %6, %c0_i32_3 : i32
    scf.if %7 {
      %c1024_i32 = arith.constant 1024 : i32
      %21 = arith.muli %arg1, %c1024_i32 : i32
      %22 = tpu.assume_multiple %21, 128 : i32
      %c0 = arith.constant 0 : index
      %23 = arith.index_cast %22 : i32 to index
      %24 = vector.load %arg2[%c0, %23] : memref<2x1024xf32, #tpu.memory_space<vmem>>, vector<2x1024xf32>
      %25 = arith.truncf %24 : vector<2x1024xf32> to vector<2x1024xbf16>
      %c0_11 = arith.constant 0 : index
      %c0_12 = arith.constant 0 : index
      %26 = vector.load %arg8[%c0_11, %c0_12] : memref<2x32xf32, #tpu.memory_space<vmem>>, vector<2x32xf32>
      %c0_13 = arith.constant 0 : index
      %c0_14 = arith.constant 0 : index
      %27 = vector.load %arg3[%c0_13, %c0_14] : memref<32x1024xbf16, #tpu.memory_space<vmem>>, vector<32x1024xbf16>
      %cst = arith.constant dense<0.000000e+00> : vector<2x32xf32>
      %28 = tpu.matmul %25, %27, %cst {dimension_numbers = #tpu.dot_dimension_numbers<[1], [1], [0], [0], [0, 0, 1, 0], [], []>} : vector<2x1024xbf16>, vector<32x1024xbf16>, vector<2x32xf32> -> vector<2x32xf32>
      %29 = arith.addf %26, %28 : vector<2x32xf32>
      %c0_15 = arith.constant 0 : index
      %c0_16 = arith.constant 0 : index
      %30 = vector.load %arg8[%c0_15, %c0_16] : memref<2x32xf32, #tpu.memory_space<vmem>>, vector<2x32xf32>
      tpu.vector_store %arg8[%c0_15, %c0_16], %29 {strides = array<i32>} : memref<2x32xf32, #tpu.memory_space<vmem>>, vector<2x32xf32>,
    } else {
    }
    %c0_i32_4 = arith.constant 0 : i32
    %8 = arith.cmpi eq, %arg0, %c0_i32_4 : i32
    %c0_i32_5 = arith.constant 0 : i32
    %9 = arith.cmpi eq, %arg1, %c0_i32_5 : i32
    %10 = arith.andi %8, %9 : i1
    %11 = arith.extui %10 : i1 to i32
    %c0_i32_6 = arith.constant 0 : i32
    %12 = arith.cmpi ne, %11, %c0_i32_6 : i32
    scf.if %12 {
      %c0 = arith.constant 0 : index
      %c0_11 = arith.constant 0 : index
      %21 = vector.load %arg8[%c0, %c0_11] : memref<2x32xf32, #tpu.memory_space<vmem>>, vector<2x32xf32>
      %c0_12 = arith.constant 0 : index
      %c0_13 = arith.constant 0 : index
      %22 = vector.load %arg4[%c0_12, %c0_13] : memref<1x32xf32, #tpu.memory_space<vmem>>, vector<1x32xf32>
      %23 = vector.broadcast %22 : vector<1x32xf32> to vector<2x32xf32>
      %24 = arith.addf %21, %23 : vector<2x32xf32>
      %cst = arith.constant 0.000000e+00 : f32
      %25 = vector.broadcast %cst : f32 to vector<2x32xf32>
      %26 = arith.maximumf %24, %25 : vector<2x32xf32>
      %c0_14 = arith.constant 0 : index
      %c0_15 = arith.constant 0 : index
      %27 = vector.load %arg8[%c0_14, %c0_15] : memref<2x32xf32, #tpu.memory_space<vmem>>, vector<2x32xf32>
      tpu.vector_store %arg8[%c0_14, %c0_15], %26 {strides = array<i32>} : memref<2x32xf32, #tpu.memory_space<vmem>>, vector<2x32xf32>,
    } else {
    }
    %c1_i32 = arith.constant 1 : i32
    %13 = arith.cmpi eq, %arg0, %c1_i32 : i32
    %14 = arith.extui %13 : i1 to i32
    %c0_i32_7 = arith.constant 0 : i32
    %15 = arith.cmpi ne, %14, %c0_i32_7 : i32
    scf.if %15 {
      %c0 = arith.constant 0 : index
      %c0_11 = arith.constant 0 : index
      %21 = vector.load %arg8[%c0, %c0_11] : memref<2x32xf32, #tpu.memory_space<vmem>>, vector<2x32xf32>
      %22 = arith.truncf %21 : vector<2x32xf32> to vector<2x32xbf16>
      %c0_12 = arith.constant 0 : index
      %c0_13 = arith.constant 0 : index
      %23 = vector.load %arg5[%c0_12, %c0_13] : memref<32x1024xbf16, #tpu.memory_space<vmem>>, vector<32x1024xbf16>
      %cst = arith.constant dense<0.000000e+00> : vector<2x1024xf32>
      %24 = tpu.matmul %22, %23, %cst {dimension_numbers = #tpu.dot_dimension_numbers<[1], [0], [0], [1], [0, 0, 1, 1], [], []>} : vector<2x32xbf16>, vector<32x1024xbf16>, vector<2x1024xf32> -> vector<2x1024xf32>
      %c0_14 = arith.constant 0 : index
      %c0_15 = arith.constant 0 : index
      %25 = vector.load %arg6[%c0_14, %c0_15] : memref<1x1024xf32, #tpu.memory_space<vmem>>, vector<1x1024xf32>
      %26 = vector.broadcast %25 : vector<1x1024xf32> to vector<2x1024xf32>
      %27 = arith.addf %24, %26 : vector<2x1024xf32>
      %c1024_i32 = arith.constant 1024 : i32
      %28 = arith.muli %arg1, %c1024_i32 : i32
      %29 = tpu.assume_multiple %28, 128 : i32
      %c0_16 = arith.constant 0 : index
      %30 = arith.index_cast %29 : i32 to index
      %31 = vector.load %arg2[%c0_16, %30] : memref<2x1024xf32, #tpu.memory_space<vmem>>, vector<2x1024xf32>
      %32 = arith.subf %27, %31 : vector<2x1024xf32>
      %c0_17 = arith.constant 0 : index
      %c0_18 = arith.constant 0 : index
      %33 = vector.load %arg9[%c0_17, %c0_18] : memref<2x1024xf32, #tpu.memory_space<vmem>>, vector<2x1024xf32>
      %34 = arith.mulf %32, %32 : vector<2x1024xf32>
      %35 = arith.addf %33, %34 : vector<2x1024xf32>
      %c0_19 = arith.constant 0 : index
      %c0_20 = arith.constant 0 : index
      %36 = vector.load %arg9[%c0_19, %c0_20] : memref<2x1024xf32, #tpu.memory_space<vmem>>, vector<2x1024xf32>
      tpu.vector_store %arg9[%c0_19, %c0_20], %35 {strides = array<i32>} : memref<2x1024xf32, #tpu.memory_space<vmem>>, vector<2x1024xf32>,
    } else {
    }
    %c1_i32_8 = arith.constant 1 : i32
    %16 = arith.cmpi eq, %arg0, %c1_i32_8 : i32
    %c0_i32_9 = arith.constant 0 : i32
    %17 = arith.cmpi eq, %arg1, %c0_i32_9 : i32
    %18 = arith.andi %16, %17 : i1
    %19 = arith.extui %18 : i1 to i32
    %c0_i32_10 = arith.constant 0 : i32
    %20 = arith.cmpi ne, %19, %c0_i32_10 : i32
    scf.if %20 {
      %c0 = arith.constant 0 : index
      %c0_11 = arith.constant 0 : index
      %21 = vector.load %arg9[%c0, %c0_11] : memref<2x1024xf32, #tpu.memory_space<vmem>>, vector<2x1024xf32>
      %22 = vector.shape_cast %21 : vector<2x1024xf32> to vector<1x2x1024xf32>
      %cst = arith.constant dense<0.000000e+00> : vector<1xf32>
      %23 = vector.multi_reduction <add>, %22, %cst [1, 2] : vector<1x2x1024xf32> to vector<1xf32>
      %24 = vector.shape_cast %23 : vector<1xf32> to vector<1x1x1xf32>
      %25 = vector.extract %24[0, 0, 0] : f32 from vector<1x1x1xf32>
      %26 = vector.broadcast %25 : f32 to vector<1x1xf32>
      %cst_12 = arith.constant 4.8828125E-4 : f32
      %27 = vector.broadcast %cst_12 : f32 to vector<1x1xf32>
      %28 = arith.mulf %26, %27 : vector<1x1xf32>
      %c0_13 = arith.constant 0 : index
      %c0_14 = arith.constant 0 : index
      %29 = vector.load %arg7[%c0_13, %c0_14] : memref<1x1xf32, #tpu.memory_space<vmem>>, vector<1x1xf32>
      tpu.vector_store %arg7[%c0_13, %c0_14], %28 {strides = array<i32>} : memref<1x1xf32, #tpu.memory_space<vmem>>, vector<1x1xf32>,
    } else {
    }
    return
  }
  func.func @transform_0(%arg0: i32, %arg1: i32) -> (i32, i32) {
    %c0_i32 = arith.constant 0 : i32
    %c0_i32_0 = arith.constant 0 : i32
    %c0_i32_1 = arith.constant 0 : i32
    return %c0_i32, %c0_i32_0 : i32, i32
  }
  func.func @transform_1(%arg0: i32, %arg1: i32) -> (i32, i32) {
    %c1_i32 = arith.constant 1 : i32
    %0 = arith.subi %c1_i32, %arg0 : i32
    %1 = arith.muli %arg1, %0 : i32
    %c0_i32 = arith.constant 0 : i32
    %2 = arith.muli %c0_i32, %arg0 : i32
    %3 = arith.addi %1, %2 : i32
    %c0_i32_0 = arith.constant 0 : i32
    %c0_i32_1 = arith.constant 0 : i32
    return %c0_i32_0, %3 : i32, i32
  }
  func.func @transform_2(%arg0: i32, %arg1: i32) -> (i32, i32) {
    %c0_i32 = arith.constant 0 : i32
    %c0_i32_0 = arith.constant 0 : i32
    %c0_i32_1 = arith.constant 0 : i32
    return %c0_i32, %c0_i32_0 : i32, i32
  }
  func.func @transform_3(%arg0: i32, %arg1: i32) -> (i32, i32) {
    %0 = arith.muli %arg1, %arg0 : i32
    %c0_i32 = arith.constant 0 : i32
    %c0_i32_0 = arith.constant 0 : i32
    return %c0_i32, %0 : i32, i32
  }
  func.func @transform_4(%arg0: i32, %arg1: i32) -> (i32, i32) {
    %0 = arith.muli %arg1, %arg0 : i32
    %c0_i32 = arith.constant 0 : i32
    %c0_i32_0 = arith.constant 0 : i32
    return %c0_i32, %0 : i32, i32
  }
  func.func @transform_5(%arg0: i32, %arg1: i32) -> (i32, i32) {
    %c0_i32 = arith.constant 0 : i32
    %c0_i32_0 = arith.constant 0 : i32
    %c0_i32_1 = arith.constant 0 : i32
    return %c0_i32, %c0_i32_0 : i32, i32
  }
}

</mosaic_0001>

<bundles_post_ra>
// kernel: ae_bottleneck_loss.1
= control target key start
LH: loop header
LB: loop body
LE: loop exit
PB: predicated region body
PF: predicated region fallthrough
CT: control target
= control target key end

     0   :  { %10 = vsyncpa [#allocation5], 0  ;;  %s1845_s0 = inlined_call_operand.hbm [shape: f32[2,1024], index: 0, kind: input, shape index: {}]   ;;  %s1846_s1 = inlined_call_operand.hbm [shape: bf16[32,1024], index: 1, kind: input, shape index: {}]   ;;  %s1847_s2 = inlined_call_operand.vmem [shape: f32[1,32], index: 2, kind: input, shape index: {}]   ;;  %s1848_s3 = inlined_call_operand.hbm [shape: bf16[32,1024], index: 3, kind: input, shape index: {}]   ;;  %s1849_s4 = inlined_call_operand.hbm [shape: f32[1,1024], index: 4, kind: input, shape index: {}]   ;;  %s1850_s5 = inlined_call_operand.hbm [shape: f32[1,1], index: 5, kind: output, shape index: {}]  }
   0x1   :  { %11 = vsyncpa [#allocation8], 0 }
   0x2   :  { %13 = vsyncpa [#allocation8 + $0x1], 0 }
   0x3   :  { %14 = vsyncpa [#allocation11], 0 }
   0x4   :  { %16 = vsyncpa [#allocation11 + $0x1], 0 }
   0x5   :  { %17 = vsyncpa [#allocation6], 0  ;;  %s1688_s18 = smov 0   ;;  %s1690_s19 = smov 0  }
   0x6   :  { %s1692_s20 = smov 0  }
   0x7 LB: > { %s1646_s21 = smov [#allocation7]   ;;  %p1426_p0 = scmp.lt.s32.totalorder %s1644_s20, 2  ;;  %s1644_s20 = sphi %s1692_s20, %s23_s20   ;;  %s1640_s19 = sphi %s1690_s19, %s1862_s19   ;;  %s1636_s18 = sphi %s1688_s18, %s1861_s18  }
   0x8   : > { %s229_s22 = sshll.u32 %s1646_s21, 4  ;;  %p1427_p1 = scmp.eq.s32.totalorder %s1644_s20, 0  ;;  %s230_s22 = int_to_ptr.vmem [resolvable:$true] %s229_s22 }
   0x9   : > { %s216_s23 = sand.u32 1, %s1644_s20   ;;  %s1489_s26 = scalar_lea.vmem %s230_s22, 2048 }
   0xa   : > { %p1706_p2 = pnand %p1427_p1, %p1426_p0  ;;  %s1710_s25 = scalar_lea.sflag [#allocation8], %s216_s23 }
   0xb   : > { %p1490_p4 = scmp.ne.s32.totalorder %s230_s22, %s1489_s26  ;;  %s1496_s27 = scalar_lea.vmem %s230_s22, 4096 }
   0xc   : > { %p1480_p3 = pneg %p1706_p2  ;;  %p1497_p7 = scmp.lt.s32.totalorder %s230_s22, %s230_s22 }
   0xd   : > { %p1498_p8 = scmp.lt.s32.totalorder %s1496_s27, %s1489_s26 }
   0xe   : > { %p1492_p5 = pnand %p1490_p4, %p1480_p3 }
   0xf   : > { %p1499_p9 = por %p1498_p8, %p1497_p7 }
  0x10   : > { %p1493_p6 = pneg %p1492_p5 }
  0x12   : > { %p1500_p10 = pnand %p1499_p9, %p1493_p6 }
  0x14   : > { %1503 = shalt.err (!%p1500_p10)
}
  0x15   : > { %s1647_s28 = smov 512   ;;  %s1648_s29 = smov 32  }
  0x16   : > { %1418 = dma.hbm_to_vmem [thread:$0]  (!%p1706_p2), %s1846_s1, 2048, %s230_s22, %s1710_s25, %s1647_s28, %s1647_s28, %s1648_s29  }
  0x17   : > { %s1727_s7 = sadd.s32 4294967295, %s1644_s20   ;;  %s35_s8 = sadd.s32 1, %s1640_s19 }
  0x18   : > { %p1331_p11 = scmp.ge.s32.totalorder %s1644_s20, 1  ;;  %p37_p12 = scmp.ge.s32.totalorder %s35_s8, 2 }
  0x19   : > { %p189_p13 = scmp.lt.s32.totalorder %s1644_s20, 3  ;;  %p1851_p0 = scmp.eq.s32.totalorder %s1727_s7, 0 }
  0x1a   : > { %s1864_s8 = smov (%p37_p12, %s35_s8), 0  ;;  %s1649_s10 = smov [#allocation4]  }
  0x1b   : > { %p1735_p1 = pnand %p1331_p11, %p189_p13  ;;  %s202_s11 = sshll.u32 %s1649_s10, 4  ;;  %s203_s11 = int_to_ptr.vmem [resolvable:$true] %s202_s11 }
  0x1c   : > { %s1650_s12 = smov [#allocation9]  }
  0x1d   : > { %p1411_p4 = pneg %p1735_p1  ;;  %s251_s13 = sshll.u32 %s1650_s12, 4  ;;  %s252_s13 = int_to_ptr.vmem [resolvable:$true] %s251_s13 }
  0x1e   : > { %s1515_s15 = scalar_lea.vmem %s252_s13, 2048  ;;  %s1522_s16 = scalar_lea.vmem %s252_s13, 4096 }
  0x1f   : > { %p1743_p5 = pnand %p1851_p0, %p1411_p4  ;;  %p1516_p6 = scmp.ne.s32.totalorder %s252_s13, %s1515_s15 }
  0x20   : > { %p1523_p9 = scmp.lt.s32.totalorder %s252_s13, %s252_s13  ;;  %p1524_p10 = scmp.lt.s32.totalorder %s1522_s16, %s1515_s15 }
  0x21   : > { %p1518_p7 = pnand %p1516_p6, %p1480_p3 }
  0x22   : > { %p1525_p11 = por %p1524_p10, %p1523_p9 }
  0x23   : > { %p1519_p8 = pneg %p1518_p7 }
  0x25   : > { %p1526_p12 = pnand %p1525_p11, %p1519_p8 }
  0x27   : > { %1529 = shalt.err (!%p1526_p12)
}
  0x28   : > { %1421 = dma.hbm_to_vmem [thread:$0]  (!%p1706_p2), %s1848_s3, 2048, %s252_s13, %s1710_s25, %s1647_s28, %s1647_s28, %s1648_s29  }
  0x29   : > { %s1651_s22 = smov [#allocation10]   ;;  %p1532_p13 = pneg %p1743_p5 }
  0x2a   : > { %s274_s23 = sshll.u32 %s1651_s22, 4  ;;  %s1541_s26 = scalar_lea.vmem %s203_s11, 256  ;;  %s275_s23 = int_to_ptr.vmem [resolvable:$true] %s274_s23 }
  0x2b   : > { %p1542_p4 = scmp.ne.s32.totalorder %s203_s11, %s1541_s26  ;;  %p1549_p8 = scmp.lt.s32.totalorder %s203_s11, %s203_s11 }
  0x2c   : > { %p1550_p9 = scmp.lt.s32.totalorder %s1541_s26, %s1541_s26 }
  0x2d   : > { %p1544_p6 = pnand %p1542_p4, %p1532_p13 }
  0x2e   : > { %p1551_p10 = por %p1550_p9, %p1549_p8 }
  0x2f   : > { %p1545_p7 = pneg %p1544_p6 }
  0x31   : > { %p1552_p11 = pnand %p1551_p10, %p1545_p7 }
  0x33   : > { %1555 = shalt.err (!%p1552_p11)
}
  0x34   : > { %1414 = dma.hbm_to_vmem [thread:$0]  (!%p1743_p5), %s1845_s0, 256, %s203_s11, [#allocation5]  }
  0x35   : > { %s1567_s25 = scalar_lea.vmem %s275_s23, 128  ;;  %s1574_s28 = scalar_lea.vmem %s275_s23, 256 }
  0x36   : > { %p1568_p12 = scmp.ne.s32.totalorder %s275_s23, %s1567_s25  ;;  %p1575_p4 = scmp.lt.s32.totalorder %s275_s23, %s275_s23 }
  0x37   : > { %p1576_p6 = scmp.lt.s32.totalorder %s1574_s28, %s1567_s25 }
  0x38   : > { %p1570_p0 = pnand %p1568_p12, %p1480_p3 }
  0x39   : > { %p1577_p8 = por %p1576_p6, %p1575_p4 }
  0x3a   : > { %p1571_p13 = pneg %p1570_p0 }
  0x3c   : > { %p1578_p7 = pnand %p1577_p8, %p1571_p13 }
  0x3e   : > { %1581 = shalt.err (!%p1578_p7)
}
  0x3f   : > { %1424 = dma.hbm_to_vmem [thread:$0]  (!%p1706_p2), %s1849_s4, 128, %s275_s23, [#allocation11]  }
  0x40   : > { %283 = sbr.rel (%p1735_p1) target bundleno = 822 (0x336), region = 40  ;;  %p1855_p5 = scmp.eq.s32.totalorder (!%p1735_p1), %s1727_s7, 0 }
  0x45   : > { %1619 = dma.done.wait (%p1855_p5), [#allocation5], 256   ;;  %p1856_p3 = pmov %p1855_p5 }
  0x46   : > { %s289_s10 = sand.u32 1, %s1727_s7  }
  0x47   : > { %1621 = vsyncadd (%p1856_p3), [#allocation5], 4294967040  ;;  %s290_s11 = scalar_lea.sflag [#allocation8], %s289_s10  ;;  %p1857_p0 = pmov %p1856_p3 }
  0x49   : > { %1623 = dma.done.wait (%p1857_p0), %s290_s11, 4096   ;;  %p1858_p9 = pmov %p1857_p0 }
  0x4a   : > { %p1859_p2 = pmov %p1857_p0 }
  0x4b   : > { %1625 = vsyncadd (%p1858_p9), %s290_s11, 4294963200 }
  0x4c   : > { %1627 = dma.done.wait (%p1859_p2), [#allocation11], 128   ;;  %p1860_p1 = pmov %p1857_p0 }
  0x4d   : > { %p351_p10 = scmp.eq.s32.totalorder %s1636_s18, 0 }
  0x4e   : > { %1629 = vsyncadd (%p1860_p1), [#allocation11], 4294967168  ;;  %vm357_vm0 = vcmask (%p351_p10), 254976   ;;  %v1652_v0 = vmov (%p351_p10), 0.0  }
  0x4f   : > { %356 = sbr.rel (!%p351_p10) target bundleno = 84 (0x54), region = 60  ;;  %358 = vst.msk [vmem:[#allocation2] sm:$0x3] (%p351_p10), %vm357_vm0, %v1652_v0  ;;  %359 = vst [vmem:[#allocation3] sm:$0xff] (%p351_p10), %v1652_v0 }
  0x50   : > { %360 = vst [vmem:[#allocation3 + $0x8] sm:$0xff] (%p351_p10), %v1652_v0 }
  0x54 PF: > { %p1343_p11 = scmp.ne.s32.totalorder %s1636_s18, 0 }
  0x56   : > { %363 = sbr.rel (%p1343_p11) target bundleno = 327 (0x147), region = 64 }
  0x5b   : > { %v432_v1 = vld [vmem:[#allocation7 + $0x40] sm:$0xff]  ;;  %v433_v3 = vld [vmem:[#allocation7 + $0x48] sm:$0xff]  ;;  %v377_v4 = vlaneseq  ;;  %v1653_v10 = vmov 1983009808   ;;  %v369_v17 = vld [vmem:[#allocation4] sm:$0xff]  ;;  %vm681_vm1 = vcmask 254976  }
  0x5c   : > { %v436_v2 = vld [vmem:[#allocation7 + $0x60] sm:$0xff]  ;;  %v437_v6 = vld [vmem:[#allocation7 + $0x68] sm:$0xff]  ;;  %v375_v11 = vunpack.c.l.s4 %v1653_v10  ;;  %v373_v21 = vcombine.high %v369_v17, %v369_v17  ;;  %v370_v23 = vld [vmem:[#allocation4 + $0x8] sm:$0xff] }
  0x5d   : > { %v1353_v5 = vcombine.high %v432_v1, %v436_v2  ;;  %v1352_v7 = vcombine.low %v432_v1, %v436_v2  ;;  %v424_v8 = vld [vmem:[#allocation7] sm:$0xff]  ;;  %v1355_v12 = vcombine.high %v433_v3, %v437_v6  ;;  %v1354_v13 = vcombine.low %v433_v3, %v437_v6  ;;  %v425_v15 = vld [vmem:[#allocation7 + $0x8] sm:$0xff]  ;;  %v434_v26 = vld [vmem:[#allocation7 + $0x50] sm:$0xff] }
  0x5e   : > { %v428_v9 = vld [vmem:[#allocation7 + $0x20] sm:$0xff]  ;;  %v429_v16 = vld [vmem:[#allocation7 + $0x28] sm:$0xff]  ;;  %v376_v19 = vunpack.c.0.s8 %v375_v11  ;;  %v378_v20 = vshrl.u32 %v377_v4, 7  ;;  %v438_v27 = vld [vmem:[#allocation7 + $0x70] sm:$0xff]  ;;  %v390_v28 = vcombine.high %v370_v23, %v370_v23 }
  0x5f   : > { %v1345_v14 = vcombine.high %v424_v8, %v428_v9  ;;  %532 = vmatprep.subr.bf16.mxu0 %v1353_v5  ;;  %v1347_v18 = vcombine.high %v425_v15, %v429_v16  ;;  %572 = vmatprep.subr.bf16.mxu1 %v1355_v12  ;;  %v1344_v29 = vcombine.low %v424_v8, %v428_v9  ;;  %v435_v30 = vld [vmem:[#allocation7 + $0x58] sm:$0xff]  ;;  %v426_v41 = vld [vmem:[#allocation7 + $0x10] sm:$0xff] }
  0x60   : > { %533 = vmatpush1.bf16.xpose.msra.mxu0 %v1352_v7  ;;  %573 = vmatpush1.bf16.xpose.msra.mxu1 %v1354_v13  ;;  %v379_v22 = vsub.s32 %v376_v19, %v378_v20  ;;  %v439_v31 = vld [vmem:[#allocation7 + $0x78] sm:$0xff]  ;;  %v1346_v32 = vcombine.low %v425_v15, %v429_v16  ;;  %v1357_v35 = vcombine.high %v434_v26, %v438_v27  ;;  %v430_v42 = vld [vmem:[#allocation7 + $0x30] sm:$0xff] }
  0x61   : > { %534 = vmatprep.subr.bf16.mxu0 %v1345_v14  ;;  %574 = vmatprep.subr.bf16.mxu1 %v1347_v18  ;;  %v1359_v39 = vcombine.high %v435_v30, %v439_v31  ;;  %v427_v45 = vld [vmem:[#allocation7 + $0x18] sm:$0xff]  ;;  %v1356_v49 = vcombine.low %v434_v26, %v438_v27  ;;  %v1358_v50 = vcombine.low %v435_v30, %v439_v31 }
  0x62   : > { %v380_v24 = vrot.slane %v369_v17, %v379_v22  ;;  %v387_v25 = vrot.slane %v373_v21, %v379_v22  ;;  %v397_v36 = vrot.slane %v370_v23, %v379_v22  ;;  %v404_v40 = vrot.slane %v390_v28, %v379_v22  ;;  %v431_v46 = vld [vmem:[#allocation7 + $0x38] sm:$0xff] }
  0x63   : > { %v1349_v51 = vcombine.high %v426_v41, %v430_v42  ;;  %v1351_v52 = vcombine.high %v427_v45, %v431_v46  ;;  %v1348_v55 = vcombine.low %v426_v41, %v430_v42  ;;  %v1350_v56 = vcombine.low %v427_v45, %v431_v46  ;;  %v423_v7 = vld [vmem:[#allocation2] sm:$0x3] }
  0x64   : > { %v388_v33 = vcombine.high %v380_v24, %v380_v24  ;;  %v389_v34 = vcombine.high %v387_v25, %v387_v25  ;;  %v405_v43 = vcombine.high %v397_v36, %v397_v36  ;;  %v415_v44 = vpack.c.bf16 %v380_v24, %v380_v24 }
  0x65   : > { %v406_v47 = vcombine.high %v404_v40, %v404_v40  ;;  %v417_v48 = vpack.c.bf16 %v387_v25, %v387_v25  ;;  %v419_v57 = vpack.c.bf16 %v397_v36, %v397_v36  ;;  %v421_v58 = vpack.c.bf16 %v404_v40, %v404_v40 }
  0x66   : > { %v416_v37 = vpack.c.bf16 %v388_v33, %v388_v33  ;;  %v418_v38 = vpack.c.bf16 %v389_v34, %v389_v34  ;;  %v420_v53 = vpack.c.bf16 %v405_v43, %v405_v43 }
  0x67   : > { %v422_v54 = vpack.c.bf16 %v406_v47, %v406_v47 }
  0x68   : > { %535 = vmatpush1.bf16.xpose.msra.mxu0 %v1344_v29  ;;  %575 = vmatpush1.bf16.xpose.msra.mxu1 %v1346_v32 }
  0x69   : > { %552 = vmatprep.mubr.bf16.mxu0 %v416_v37  ;;  %592 = vmatprep.mubr.bf16.mxu1 %v418_v38 }
  0x6a   : > { %612 = vmatprep.subr.bf16.mxu0 %v1357_v35  ;;  %652 = vmatprep.subr.bf16.mxu1 %v1359_v39 }
  0x6f   : > { %553 = vmatmul.mubr.bf16.vlgmr.msra.gmra.mxu0 %v415_v44  ;;  %593 = vmatmul.mubr.bf16.vlgmr.msra.gmra.mxu1 %v417_v48 }
  0x70   : > { %613 = vmatpush1.bf16.xpose.msra.mxu0 %v1356_v49  ;;  %653 = vmatpush1.bf16.xpose.msra.mxu1 %v1358_v50 }
  0x71   : > { %614 = vmatprep.subr.bf16.mxu0 %v1349_v51  ;;  %654 = vmatprep.subr.bf16.mxu1 %v1351_v52 }
  0x72   : > { %632 = vmatprep.mubr.bf16.mxu0 %v420_v53  ;;  %672 = vmatprep.mubr.bf16.mxu1 %v422_v54 }
  0x78   : > { %615 = vmatpush1.bf16.xpose.msra.mxu0 %v1348_v55  ;;  %655 = vmatpush1.bf16.xpose.msra.mxu1 %v1350_v56 }
  0x7f   : > { %633 = vmatmul.mubr.bf16.vlgmr.msra.gmra.mxu0 %v419_v57  ;;  %673 = vmatmul.mubr.bf16.vlgmr.msra.gmra.mxu1 %v421_v58 }
 0x12f   : > { %v554_v59 = vpop.f32.mrf.mxu0  ;;  %v594_v60 = vpop.f32.mrf.mxu1 }
 0x130   : > { %v595_v3 = vadd.f32 %v594_v60, %v554_v59 }
 0x131   : > { %v556_v61 = vpop.f32.mrf.mxu0  ;;  %v596_v62 = vpop.f32.mrf.mxu1 }
 0x133   : > { %v557_v63 = vpop.f32.mrf.mxu0  ;;  %v597_v0 = vpop.f32.mrf.mxu1 }
 0x135   : > { %v558_v1 = vpop.f32.mrf.mxu0  ;;  %v598_v2 = vpop.f32.mrf.mxu1 }
 0x13f   : > { %v634_v4 = vpop.f32.mrf.mxu0  ;;  %v674_v6 = vpop.f32.mrf.mxu1 }
 0x140   : > { %v635_v5 = vadd.f32 %v634_v4, %v595_v3 }
 0x141   : > { %v636_v8 = vpop.f32.mrf.mxu0  ;;  %v676_v10 = vpop.f32.mrf.mxu1 }
 0x142   : > { %v675_v9 = vadd.f32 %v674_v6, %v635_v5 }
 0x143   : > { %v637_v11 = vpop.f32.mrf.mxu0  ;;  %v677_v13 = vpop.f32.mrf.mxu1 }
 0x144   : > { %v680_v12 = vadd.f32 %v675_v9, %v423_v7 }
 0x145   : > { %v638_v14 = vpop.f32.mrf.mxu0  ;;  %v678_v15 = vpop.f32.mrf.mxu1 }
 0x146   : > { %682 = vst.msk [vmem:[#allocation2] sm:$0x3] %vm681_vm1, %v680_v12 }
 0x147 PF: > { %684 = sbr.rel (!%p351_p10) target bundleno = 339 (0x153), region = 68  ;;  %v1360_v17 = vld [vmem:[%s1847_s2] ss:$0 sm:$0xff] (%p351_p10)  ;;  %vm695_vm2 = vcmask (%p351_p10), 254976  }
 0x14d   : > { %v685_v16 = vld [vmem:[#allocation2] sm:$0x3] }
 0x14e   : > { %v693_v18 = vadd.f32 %v1360_v17, %v685_v16 }
 0x150   : > { %v694_v19 = vmax.f32 %v693_v18, 0.0 }
 0x152   : > { %696 = vst.msk [vmem:[#allocation2] sm:$0x3] %vm695_vm2, %v694_v19 }
 0x153 PF: > { %p697_p12 = scmp.eq.s32.totalorder %s1636_s18, 1  ;;  %p1361_p13 = scmp.ne.s32.totalorder %s1636_s18, 1 }
 0x155   : > { %700 = sbr.rel (%p1361_p13) target bundleno = 577 (0x241), region = 72 }
 0x15a   : > { %v711_v20 = vld [vmem:[#allocation9 + $0x40] sm:$0xff]  ;;  %v712_v22 = vld [vmem:[#allocation9 + $0x48] sm:$0xff]  ;;  %v1654_v28 = vmov 0   ;;  %v713_v35 = vld [vmem:[#allocation9 + $0x50] sm:$0xff]  ;;  %vm841_vm3 = vcmask 261120   ;;  %v721_v55 = vlaneseq }
 0x15b   : > { %v715_v21 = vld [vmem:[#allocation9 + $0x60] sm:$0xff]  ;;  %v716_v24 = vld [vmem:[#allocation9 + $0x68] sm:$0xff]  ;;  %877 = vmatprep.mubr.bf16.mxu0 %v1654_v28  ;;  %918 = vmatprep.mubr.bf16.mxu1 %v1654_v28  ;;  %v717_v36 = vld [vmem:[#allocation9 + $0x70] sm:$0xff]  ;;  %v1655_v56 = vmov 1983009808  }
 0x15c   : > { %v1371_v23 = vcombine.high %v711_v20, %v715_v21  ;;  %v1370_v25 = vcombine.low %v711_v20, %v715_v21  ;;  %v703_v26 = vld [vmem:[#allocation9] sm:$0xff]  ;;  %v1373_v29 = vcombine.high %v712_v22, %v716_v24  ;;  %v1372_v30 = vcombine.low %v712_v22, %v716_v24  ;;  %v704_v32 = vld [vmem:[#allocation9 + $0x8] sm:$0xff]  ;;  %v714_v37 = vld [vmem:[#allocation9 + $0x58] sm:$0xff] }
 0x15d   : > { %v707_v27 = vld [vmem:[#allocation9 + $0x20] sm:$0xff]  ;;  %v708_v33 = vld [vmem:[#allocation9 + $0x28] sm:$0xff]  ;;  %v701_v39 = vld [vmem:[#allocation2] sm:$0x3]  ;;  %v1375_v42 = vcombine.high %v713_v35, %v717_v36  ;;  %v1374_v49 = vcombine.low %v713_v35, %v717_v36  ;;  %v1020_v57 = vunpack.c.l.s4 %v1655_v56  ;;  %v722_v58 = vshrl.u32 %v721_v55, 7 }
 0x15e   : > { %v1363_v31 = vcombine.high %v703_v26, %v707_v27  ;;  %857 = vmatprep.subr.bf16.mxu0 %v1371_v23  ;;  %v1365_v34 = vcombine.high %v704_v32, %v708_v33  ;;  %898 = vmatprep.subr.bf16.mxu1 %v1373_v29  ;;  %v1362_v38 = vcombine.low %v703_v26, %v707_v27  ;;  %v718_v40 = vld [vmem:[#allocation9 + $0x78] sm:$0xff]  ;;  %v705_v44 = vld [vmem:[#allocation9 + $0x10] sm:$0xff]  ;;  %v719_v63 = vld [vmem:[#allocation10] sm:$0xff] }
 0x15f   : > { %858 = vmatpush1.bf16.msra.mxu0 %v1370_v25  ;;  %899 = vmatpush1.bf16.msra.mxu1 %v1372_v30  ;;  %v1364_v41 = vcombine.low %v704_v32, %v708_v33  ;;  %v1377_v43 = vcombine.high %v714_v37, %v718_v40  ;;  %v709_v45 = vld [vmem:[#allocation9 + $0x30] sm:$0xff]  ;;  %v702_v46 = vpack.c.bf16 %v701_v39, %v701_v39  ;;  %v706_v47 = vld [vmem:[#allocation9 + $0x18] sm:$0xff]  ;;  %v1021_v59 = vunpack.c.0.s8 %v1020_v57 }
 0x160   : > { %859 = vmatprep.subr.bf16.mxu0 %v1363_v31  ;;  %900 = vmatprep.subr.bf16.mxu1 %v1365_v34  ;;  %v710_v48 = vld [vmem:[#allocation9 + $0x38] sm:$0xff]  ;;  %v1376_v50 = vcombine.low %v714_v37, %v718_v40  ;;  %v1367_v51 = vcombine.high %v705_v44, %v709_v45  ;;  %v1366_v53 = vcombine.low %v705_v44, %v709_v45  ;;  %v1014_v60 = vld [vmem:[#allocation4] sm:$0xff]  ;;  %v723_v61 = vsub.s32 0, %v722_v58 }
 0x161   : > { %v1369_v52 = vcombine.high %v706_v47, %v710_v48  ;;  %v1368_v54 = vcombine.low %v706_v47, %v710_v48  ;;  %v1804_v62 = vsub.s32 %v1021_v59, %v722_v58  ;;  %v731_v0 = vsub.s32 2, %v722_v58  ;;  %v1015_v9 = vld [vmem:[#allocation4 + $0x8] sm:$0xff] }
 0x162   : > { %v1018_v1 = vcombine.high %v1014_v60, %v1014_v60  ;;  %v727_v2 = vsub.s32 1, %v722_v58  ;;  %v735_v3 = vsub.s32 3, %v722_v58  ;;  %v724_v4 = vrot.slane %v719_v63, %v723_v61  ;;  %v1068_v61 = vld [vmem:[#allocation3] sm:$0xff] }
 0x163   : > { %860 = vmatpush1.bf16.msra.mxu0 %v1362_v38  ;;  %901 = vmatpush1.bf16.msra.mxu1 %v1364_v41  ;;  %v1025_v5 = vrot.slane %v1014_v60, %v1804_v62  ;;  %v732_v6 = vrot.slane %v719_v63, %v731_v0  ;;  %v739_v15 = vsub.s32 4, %v722_v58  ;;  %v747_v19 = vsub.s32 6, %v722_v58 }
 0x164   : > { %939 = vmatprep.subr.bf16.mxu0 %v1375_v42  ;;  %980 = vmatprep.subr.bf16.mxu1 %v1377_v43  ;;  %v1032_v7 = vrot.slane %v1018_v1, %v1804_v62  ;;  %v728_v8 = vrot.slane %v719_v63, %v727_v2  ;;  %v736_v11 = vrot.slane %v719_v63, %v735_v3  ;;  %v743_v24 = vsub.s32 5, %v722_v58 }
 0x165   : > { %v1033_v14 = vcombine.high %v1025_v5, %v1025_v5  ;;  %v1035_v20 = vcombine.high %v1015_v9, %v1015_v9  ;;  %v740_v31 = vrot.slane %v719_v63, %v739_v15  ;;  %v1042_v32 = vrot.slane %v1015_v9, %v1804_v62 }
 0x166   : > { %1378 = vmatmul.mubr.msk.bf16.vlgmr.msra.gmra.mxu0 %vm841_vm3, %v702_v46  ;;  %1379 = vmatmul.mubr.msk.bf16.vlgmr.msra.gmra.mxu1 %vm841_vm3, %v702_v46  ;;  %v1034_v18 = vcombine.high %v1032_v7, %v1032_v7  ;;  %v748_v35 = vrot.slane %v719_v63, %v747_v19  ;;  %v744_v40 = vrot.slane %v719_v63, %v743_v24 }
 0x167   : > { %940 = vmatpush1.bf16.msra.mxu0 %v1374_v49  ;;  %981 = vmatpush1.bf16.msra.mxu1 %v1376_v50  ;;  %v1049_v36 = vrot.slane %v1035_v20, %v1804_v62  ;;  %v1050_v48 = vcombine.high %v1042_v32, %v1042_v32 }
 0x168   : > { %941 = vmatprep.subr.bf16.mxu0 %v1367_v51  ;;  %982 = vmatprep.subr.bf16.mxu1 %v1369_v52 }
 0x169   : > { %959 = vmatprep.mubr.bf16.mxu0 %v1654_v28  ;;  %1000 = vmatprep.mubr.bf16.mxu1 %v1654_v28  ;;  %v751_v28 = vsub.s32 7, %v722_v58  ;;  %v1051_v52 = vcombine.high %v1049_v36, %v1049_v36 }
 0x16b   : > { %942 = vmatpush1.bf16.msra.mxu0 %v1366_v53  ;;  %983 = vmatpush1.bf16.msra.mxu1 %v1368_v54  ;;  %v752_v44 = vrot.slane %v719_v63, %v751_v28 }
 0x16e   : > { %1380 = vmatmul.mubr.msk.bf16.vlgmr.msra.gmra.mxu0 %vm841_vm3, %v702_v46  ;;  %1381 = vmatmul.mubr.msk.bf16.vlgmr.msra.gmra.mxu1 %vm841_vm3, %v702_v46 }
 0x226   : > { %v879_v10 = vpop.f32.mrf.mxu0  ;;  %v920_v13 = vpop.f32.mrf.mxu1 }
 0x227   : > { %v880_v12 = vadd.f32 %v879_v10, %v724_v4  ;;  %v921_v16 = vadd.f32 %v920_v13, %v732_v6 }
 0x228   : > { %v881_v17 = vpop.f32.mrf.mxu0  ;;  %v922_v23 = vpop.f32.mrf.mxu1 }
 0x229   : > { %v1060_v21 = vsub.f32 %v880_v12, %v1025_v5  ;;  %v882_v22 = vadd.f32 %v881_v17, %v728_v8  ;;  %v1062_v25 = vsub.f32 %v921_v16, %v1032_v7  ;;  %v923_v26 = vadd.f32 %v922_v23, %v736_v11 }
 0x22a   : > { %v883_v27 = vpop.f32.mrf.mxu0  ;;  %v924_v30 = vpop.f32.mrf.mxu1 }
 0x22b   : > { %v1061_v29 = vsub.f32 %v882_v22, %v1033_v14  ;;  %v1063_v33 = vsub.f32 %v923_v26, %v1034_v18  ;;  %v1070_v37 = vmul.f32 %v1060_v21, %v1060_v21  ;;  %v1072_v41 = vmul.f32 %v1062_v25, %v1062_v25  ;;  %v1069_v14 = vld [vmem:[#allocation3 + $0x8] sm:$0xff] }
 0x22c   : > { %v884_v34 = vpop.f32.mrf.mxu0  ;;  %v925_v39 = vpop.f32.mrf.mxu1 }
 0x22d   : > { %v1071_v38 = vmul.f32 %v1061_v29, %v1061_v29  ;;  %v1073_v42 = vmul.f32 %v1063_v33, %v1063_v33 }
 0x22e   : > { %v961_v43 = vpop.f32.mrf.mxu0  ;;  %v1002_v47 = vpop.f32.mrf.mxu1 }
 0x22f   : > { %v1086_v45 = vcombine.low %v1070_v37, %v1071_v38  ;;  %v962_v46 = vadd.f32 %v961_v43, %v740_v31  ;;  %v1087_v49 = vcombine.low %v1072_v41, %v1073_v42  ;;  %v1003_v50 = vadd.f32 %v1002_v47, %v748_v35 }
 0x230   : > { %v963_v51 = vpop.f32.mrf.mxu0  ;;  %v1004_v56 = vpop.f32.mrf.mxu1 }
 0x231   : > { %v1094_v53 = vrot.slane %v1086_v45, %v1804_v62  ;;  %v1064_v54 = vsub.f32 %v962_v46, %v1042_v32  ;;  %v964_v55 = vadd.f32 %v963_v51, %v744_v40  ;;  %v1101_v57 = vrot.slane %v1087_v49, %v1804_v62 }
 0x232   : > { %v1066_v58 = vsub.f32 %v1003_v50, %v1049_v36  ;;  %v1005_v59 = vadd.f32 %v1004_v56, %v752_v44  ;;  %v965_v60 = vpop.f32.mrf.mxu0  ;;  %v1006_v0 = vpop.f32.mrf.mxu1 }
 0x233   : > { %v1065_v63 = vsub.f32 %v964_v55, %v1050_v48  ;;  %v1102_v1 = vcombine.low %v1094_v53, %v1101_v57  ;;  %v1074_v4 = vmul.f32 %v1064_v54, %v1064_v54 }
 0x234   : > { %v1067_v2 = vsub.f32 %v1005_v59, %v1051_v52  ;;  %v966_v3 = vpop.f32.mrf.mxu0  ;;  %v1007_v6 = vpop.f32.mrf.mxu1  ;;  %v1076_v8 = vmul.f32 %v1066_v58, %v1066_v58 }
 0x235   : > { %v1075_v5 = vmul.f32 %v1065_v63, %v1065_v63  ;;  %v1122_v7 = vadd.f32 %v1102_v1, %v1068_v61 }
 0x236   : > { %v1077_v9 = vmul.f32 %v1067_v2, %v1067_v2 }
 0x237   : > { %v1103_v10 = vcombine.low %v1074_v4, %v1075_v5  ;;  %1124 = vst [vmem:[#allocation3] sm:$0xff] %v1122_v7 }
 0x238   : > { %v1104_v11 = vcombine.low %v1076_v8, %v1077_v9 }
 0x239   : > { %v1111_v12 = vrot.slane %v1103_v10, %v1804_v62 }
 0x23a   : > { %v1118_v13 = vrot.slane %v1104_v11, %v1804_v62 }
 0x23c   : > { %v1119_v15 = vcombine.low %v1111_v12, %v1118_v13 }
 0x23e   : > { %v1123_v16 = vadd.f32 %v1119_v15, %v1069_v14 }
 0x240   : > { %1125 = vst [vmem:[#allocation3 + $0x8] sm:$0xff] %v1123_v16 }
 0x241 PF: > { %1129 = sbr.rel (!%p697_p12) target bundleno = 807 (0x327), region = 76  ;;  %v1138_v17 = vlaneseq (%p697_p12)  ;;  %v1656_v18 = vmov (%p697_p12), 1983009808   ;;  %v1130_v20 = vld [vmem:[#allocation3] sm:$0xff] (%p697_p12)  ;;  %vm1176_vm4 = vcmask (%p697_p12), 1041408   ;;  %vm1203_vm5 = vcmask (%p697_p12), 0  }
 0x242   : > { %v1136_v19 = vunpack.c.l.s4 (%p697_p12), %v1656_v18  ;;  %v1134_v22 = vcombine.high (%p697_p12), %v1130_v20, %v1130_v20 }
 0x243   : > { %v1139_v21 = vshrl.u32 (%p697_p12), %v1138_v17, 7 }
 0x244   : > { %v1137_v23 = vunpack.c.0.s8 (%p697_p12), %v1136_v19 }
 0x246   : > { %v1140_v24 = vsub.s32 %v1137_v23, %v1139_v21 }
 0x247   : > { %v1131_v25 = vld [vmem:[#allocation3 + $0x8] sm:$0xff] }
 0x248   : > { %v1141_v26 = vrot.slane %v1130_v20, %v1140_v24  ;;  %v1148_v27 = vrot.slane %v1134_v22, %v1140_v24  ;;  %v1151_v29 = vcombine.high %v1131_v25, %v1131_v25  ;;  %v1158_v30 = vrot.slane %v1131_v25, %v1140_v24 }
 0x24a   : > { %v1149_v62 = vcombine.high %v1141_v26, %v1141_v26  ;;  %v1150_v28 = vcombine.high %v1148_v27, %v1148_v27  ;;  %v1177_v31 = vsel %vm1176_vm4, %v1141_v26, 0.0  ;;  %v1180_v33 = vsel %vm1176_vm4, %v1148_v27, 0.0 }
 0x24b   : > { %v1165_v35 = vrot.slane %v1151_v29, %v1140_v24  ;;  %v1166_v36 = vcombine.high %v1158_v30, %v1158_v30  ;;  %v1184_v39 = vsel %vm1176_vm4, %v1158_v30, 0.0 }
 0x24c   : > { %v1178_v32 = vsel %vm1176_vm4, %v1149_v62, 0.0  ;;  %v1182_v37 = vsel %vm1176_vm4, %v1150_v28, 0.0 }
 0x24d   : > { %v1179_v34 = vadd.f32 %v1178_v32, %v1177_v31  ;;  %v1167_v41 = vcombine.high %v1165_v35, %v1165_v35  ;;  %v1186_v42 = vsel %vm1176_vm4, %v1166_v36, 0.0  ;;  %v1188_v44 = vsel %vm1176_vm4, %v1165_v35, 0.0 }
 0x24f   : > { %v1181_v38 = vadd.f32 %v1180_v33, %v1179_v34  ;;  %v1190_v46 = vsel %vm1176_vm4, %v1167_v41, 0.0 }
 0x251   : > { %v1183_v40 = vadd.f32 %v1182_v37, %v1181_v38 }
 0x253   : > { %v1185_v43 = vadd.f32 %v1184_v39, %v1183_v40 }
 0x255   : > { %v1187_v45 = vadd.f32 %v1186_v42, %v1185_v43 }
 0x257   : > { %v1189_v47 = vadd.f32 %v1188_v44, %v1187_v45 }
 0x259   : > { %v1191_v48 = vadd.f32 %v1190_v46, %v1189_v47 }
 0x25b   : > { %1192 = vadd.xlane.f32.xlu0 %v1191_v48 }
 0x2e4   : > { %v1193_v49 = vpop.xlane.xlu0 %1192 }
 0x2e5   : > { %v1194_v50 = vrot.slane %v1193_v49, 4 }
 0x2e7   : > { %v1195_v51 = vadd.f32 %v1194_v50, %v1193_v49 }
 0x2e9   : > { %v1196_v52 = vrot.slane %v1195_v51, 2 }
 0x2eb   : > { %v1197_v53 = vadd.f32 %v1196_v52, %v1195_v51 }
 0x2ed   : > { %v1198_v54 = vrot.slane %v1197_v53, 1 }
 0x2ef   : > { %v1199_v55 = vadd.f32 %v1198_v54, %v1197_v53 }
 0x2f1   : > { %1389 = vpush %v1199_v55 }
 0x322   : > { %s1390_s18 = spop %1389 }
 0x323   : > { %v1201_v56 = vstv %s1390_s18 }
 0x324   : > { %v1202_v57 = vmul.f32 0.00048828125, %v1201_v56 }
 0x326   : > { %1204 = vst.msk [vmem:[#allocation12] sm:$0x1] %vm1203_vm5, %v1202_v57 }
 0x327 PF: > { %p1434_p4 = scmp.eq.s32.totalorder %s1727_s7, 1  ;;  %s1657_s12 = smov [#allocation12]  }
 0x328   : > { %s1212_s13 = sshll.u32 %s1657_s12, 4  ;;  %s1213_s13 = int_to_ptr.vmem [resolvable:$true] %s1212_s13 }
 0x329   : > { %s1582_s14 = scalar_lea.vmem %s1213_s13, 16  ;;  %s1588_s15 = scalar_lea.vmem %s1213_s13, 32 }
 0x32a   : > { %p1583_p6 = scmp.ne.s32.totalorder %s1213_s13, %s1582_s14  ;;  %p1589_p5 = scmp.lt.s32.totalorder %s1213_s13, %s1213_s13 }
 0x32b   : > { %p1590_p3 = scmp.lt.s32.totalorder %s1588_s15, %s1582_s14 }
 0x32c   : > { %p1584_p8 = pnand %p1583_p6, %p1434_p4 }
 0x32d   : > { %p1591_p0 = por %p1590_p3, %p1589_p5 }
 0x32e   : > { %p1585_p7 = pneg %p1584_p8 }
 0x330   : > { %p1592_p9 = pnand %p1591_p0, %p1585_p7 }
 0x332   : > { %1595 = shalt.err (!%p1592_p9)
}
 0x333   : > { %1408 = dma.vmem_to_hbm [thread:$0]  (%p1434_p4), %s1213_s13, 16, %s1850_s5, [#allocation6]  }
 0x334   : > { %1631 = dma.done.wait (%p1434_p4), [#allocation6], 16  }
 0x335   : > { %1633 = vsyncadd (%p1434_p4), [#allocation6], 4294967280 }
 0x336 PF: > { %s23_s20 = sadd.s32 1, %s1644_s20   ;;  %s1861_s18 = smov %s1640_s19 }
 0x337   : > { %p20_p2 = scmp.ge.s32.totalorder %s23_s20, 4   ;;  %s1862_s19 = smov %s1864_s8 }
 0x339   :  { %22 = sbr.rel (!%p20_p2) target bundleno = 7 (0x7), region = 128 }
 0x33e   :  { %1225 = vsyncpa [#allocation5], 1 }
 0x33f   :  { %1227 = vsyncpa [#allocation5 + $0x1], 1 }
 0x340   :  { %1228 = vsyncpa [#allocation8], 1 }
 0x341   :  { %1230 = vsyncpa [#allocation8 + $0x1], 1 }
 0x342   :  { %1231 = vsyncpa [#allocation11], 1 }
 0x343   :  { %1233 = vsyncpa [#allocation11 + $0x1], 1 }
 0x344   :  { %1234 = vsyncpa [#allocation6], 1 }
 0x345   :  { %1236 = vsyncpa [#allocation6 + $0x1], 1 }

</bundles_post_ra>
